<compile_context>
chip_gen: v5e
topology: v5e:2x2
jax: 0.10.0
libtpu: 0.0.40
codegen_flags: <defaults>
</compile_context>

<pallas_src>
import math

import jax
import jax.numpy as jnp
from jax.experimental import pallas as pl
from jax.experimental.pallas import tpu as pltpu


def _pe_add_kernel(x_ref, pe_ref, o_ref):
    # x_ref / o_ref: (TB, TL) tiles; pe_ref: (1, TL) -> broadcast over sublanes.
    # Add in f32 (pe table is f32); cast on the store. HBM-bound, so this is free.
    x = x_ref[...].astype(jnp.float32)
    p = pe_ref[...].astype(jnp.float32)
    o_ref[...] = (x + p).astype(o_ref.dtype)


def make_positional_encoding(d_model: int, roi_num: int = 200) -> jnp.ndarray:
    """Deterministic buffer setup (mirrors torch __init__). Returns (roi_num, d_model) f32."""
    position = jnp.arange(0, roi_num, dtype=jnp.float32)[:, None]            # (N, 1)
    div_term = jnp.exp(
        jnp.arange(0, d_model, 2, dtype=jnp.float32) * (-math.log(10000.0) / d_model)
    )                                                                        # (D/2,)
    angles = position * div_term                                             # (N, D/2)
    pe = jnp.zeros((roi_num, d_model), dtype=jnp.float32)
    pe = pe.at[:, 0::2].set(jnp.sin(angles))
    pe = pe.at[:, 1::2].set(jnp.cos(angles))
    return pe


def _choose_tiles(B: int, L: int, bytes_per_elem: int,
                  target_bytes: int = 2 * 1024 * 1024,
                  min_block_bytes: int = 256 * 1024):
    """Pick (tb, tl) for the flattened (B, L) view.

    * tl stays == L (fully contiguous rows) whenever possible; tb shrinks first and
      tl is only halved once tb is at its legal minimum.
    * tb is a multiple of 8 dividing B, or B itself (the (8, 128) tiling rule).
    * tb*tl*bytes_per_elem targets ~target_bytes (combined x+out block).
    * Guarantee >= 2 total grid steps (v7x megacore + pipeline overlap), pushing
      toward 4 while blocks remain >= min_block_bytes.
    """
    assert L % 128 == 0
    tl = L
    if B % 8 == 0:
        tb = B
        # Shrink the batch tile first (keeps rows contiguous); stay a multiple of 8
        # that divides B.
        while tb % 16 == 0 and tb * tl * bytes_per_elem > target_bytes:
            tb //= 2
    else:
        tb = B  # only legal sublane tile is the full batch dim

    # Only halve the lane tile if the minimal-tb block is still over the target.
    while tl % 256 == 0 and tb * tl * bytes_per_elem > target_bytes:
        tl //= 2

    def n_steps(tb_, tl_):
        return pl.cdiv(B, tb_) * pl.cdiv(L, tl_)

    # Hard requirement: at least 2 grid steps (2 TensorCores on v7x + pipelining).
    while n_steps(tb, tl) < 2:
        if tb % 16 == 0:
            tb //= 2
        elif tl % 256 == 0:
            tl //= 2
        else:
            break
    # Soft target: ~4 steps while blocks stay comfortably sized.
    while n_steps(tb, tl) < 4 and tb * tl * bytes_per_elem >= 2 * min_block_bytes:
        if tb % 16 == 0:
            tb //= 2
        elif tl % 256 == 0:
            tl //= 2
        else:
            break
    return tb, tl


def positional_encoding_forward(x: jnp.ndarray, pe: jnp.ndarray, *,
                                min_pallas_bytes: int = 256 * 1024,
                                donate_x: bool = False) -> jnp.ndarray:
    """x: (B, N, D); pe: (roi_num, D) with N <= roi_num. Returns x + pe[:N] (broadcast over B)."""
    B, N, D = x.shape
    roi_num, d_model = pe.shape
    assert d_model == D, "d_model mismatch between x and pe"
    assert N <= roi_num, "sequence length exceeds roi_num of the pe buffer"

    # NOTE: torch's forward only broadcasts when N == roi_num (pe[:x.size(1)] slices the
    # size-1 leading dim); slicing pe[:N] keeps identical numerics for that case and
    # degrades gracefully for shorter sequences.
    pe_used = pe[:N, :]

    out_dtype = jnp.promote_types(x.dtype, pe_used.dtype)   # torch-style promotion
    L = N * D
    x_item = jnp.dtype(x.dtype).itemsize
    o_item = jnp.dtype(out_dtype).itemsize
    pe_item = jnp.dtype(pe_used.dtype).itemsize
    total_bytes = B * L * (x_item + o_item)

    def _xla_fallback():
        return (x + pe_used[None, :, :]).astype(out_dtype)

    # Small-size / awkward-layout bypass: fixed pallas_call overhead would dominate, or
    # lane-sparse masked stores would be produced.
    if total_bytes < min_pallas_bytes or L % 128 != 0:
        return _xla_fallback()

    tb, tl = _choose_tiles(B, L, x_item + o_item)
    # Degenerate tilings (e.g. huge batch not divisible by 8): a single block would blow
    # VMEM -> let XLA handle it.
    # TODO(synk): tile on the (B, N, D) view instead of falling back for these shapes.
    if tb * tl * (x_item + o_item) > 8 * 1024 * 1024:
        return _xla_fallback()

    x2 = x.reshape(B, L)
    pe2 = pe_used.reshape(1, L)
    grid = (pl.cdiv(L, tl), pl.cdiv(B, tb))   # l outer (slow), b inner (fast)

    # Explicit VMEM budget: double-buffered x & out tiles plus the double-buffered pe
    # tile (padded to 8 sublanes), with headroom. <= 32 MiB on every generation.
    footprint = 2 * tb * tl * (x_item + o_item) + 2 * 8 * tl * pe_item
    vmem_limit = int(min(32 * 1024 * 1024, max(16 * 1024 * 1024, 2 * footprint)))

    # Optional in-place update when the caller donates x (only legal if dtypes match).
    aliases = {0: 0} if (donate_x and x.dtype == out_dtype) else {}

    out2 = pl.pallas_call(
        _pe_add_kernel,
        out_shape=jax.ShapeDtypeStruct((B, L), out_dtype),
        grid_spec=pltpu.PrefetchScalarGridSpec(
            num_scalar_prefetch=0,
            grid=grid,
            in_specs=[
                # x tile: batch walked fastest.
                pl.BlockSpec((tb, tl), lambda l, b: (b, l)),
                # pe tile: block index constant along the inner b axis -> fetched once
                # per l tile, VMEM-resident across the whole batch sweep.
                pl.BlockSpec((1, tl), lambda l, b: (0, l)),
            ],
            out_specs=pl.BlockSpec((tb, tl), lambda l, b: (b, l)),
        ),
        compiler_params=pltpu.CompilerParams(
            dimension_semantics=("parallel", "parallel"),
            vmem_limit_bytes=vmem_limit,
        ),
        cost_estimate=pl.CostEstimate(
            flops=B * L,
            transcendentals=0,
            bytes_accessed=B * L * (x_item + o_item) + L * pe_item,
        ),
        input_output_aliases=aliases,
    )(x2, pe2)
    return out2.reshape(B, N, D)


if __name__ == "__main__":
    # Shapes consistent with the module defaults: batch=2, roi_num=200, d_model=32.
    B, N, D = 2, 200, 32
    key = jax.random.PRNGKey(0)
    x = jax.random.normal(key, (B, N, D), dtype=jnp.float32)

    pe = make_positional_encoding(d_model=D, roi_num=N)
    ref = x + pe[None, :, :]

    # Force the Pallas path even at this small size (the default wrapper would take the
    # fused-XLA bypass below ~256 KiB).
    out = jax.block_until_ready(positional_encoding_forward(x, pe, min_pallas_bytes=0))
    assert out.shape == (B, N, D) and out.dtype == ref.dtype
    assert jnp.allclose(out, ref, atol=1e-6, rtol=1e-6), "Pallas path mismatch vs reference"

    # Also exercise the default wrapper (small-size bypass path).
    out2 = jax.block_until_ready(positional_encoding_forward(x, pe))
    assert jnp.allclose(out2, ref, atol=1e-6, rtol=1e-6), "bypass path mismatch vs reference"

    print("KERNEL_OK")
</pallas_src>

<mosaic_0001>
module attributes {stable_mosaic.version = 11 : i64} {
  func.func @_pe_add_kernel(%arg0: i32, %arg1: i32, %arg2: memref<2x3200xf32, #tpu.memory_space<vmem>>, %arg3: memref<1x3200xf32, #tpu.memory_space<vmem>>, %arg4: memref<2x3200xf32, #tpu.memory_space<vmem>>) attributes {dimension_semantics = [#tpu.dimension_semantics<parallel>, #tpu.dimension_semantics<parallel>], iteration_bounds = array<i64: 2, 1>, scalar_prefetch = 0 : i64, scratch_operands = 0 : i64, tpu.core_type = #tpu.core_type<tc>, window_params = [{transform_indices = @transform_0, window_bounds = array<i64: 2, 3200>}, {transform_indices = @transform_1, window_bounds = array<i64: 1, 3200>}, {transform_indices = @transform_2, window_bounds = array<i64: 2, 3200>}]} {
    %c0 = arith.constant 0 : index
    %c0_0 = arith.constant 0 : index
    %0 = vector.load %arg2[%c0, %c0_0] : memref<2x3200xf32, #tpu.memory_space<vmem>>, vector<2x3200xf32>
    %c0_1 = arith.constant 0 : index
    %c0_2 = arith.constant 0 : index
    %1 = vector.load %arg3[%c0_1, %c0_2] : memref<1x3200xf32, #tpu.memory_space<vmem>>, vector<1x3200xf32>
    %2 = vector.broadcast %1 : vector<1x3200xf32> to vector<2x3200xf32>
    %3 = arith.addf %0, %2 : vector<2x3200xf32>
    %c0_3 = arith.constant 0 : index
    %c0_4 = arith.constant 0 : index
    %4 = vector.load %arg4[%c0_3, %c0_4] : memref<2x3200xf32, #tpu.memory_space<vmem>>, vector<2x3200xf32>
    tpu.vector_store %arg4[%c0_3, %c0_4], %3 {strides = array<i32>} : memref<2x3200xf32, #tpu.memory_space<vmem>>, vector<2x3200xf32>,
    return
  }
  func.func @transform_0(%arg0: i32, %arg1: i32) -> (i32, i32) {
    %c0_i32 = arith.constant 0 : i32
    return %arg1, %arg0 : i32, i32
  }
  func.func @transform_1(%arg0: i32, %arg1: i32) -> (i32, i32) {
    %c0_i32 = arith.constant 0 : i32
    %c0_i32_0 = arith.constant 0 : i32
    return %c0_i32, %arg0 : i32, i32
  }
  func.func @transform_2(%arg0: i32, %arg1: i32) -> (i32, i32) {
    %c0_i32 = arith.constant 0 : i32
    return %arg1, %arg0 : i32, i32
  }
}

</mosaic_0001>

<bundles_post_ra>
// kernel: tpu_custom_call.1
= control target key start
LH: loop header
LB: loop body
LE: loop exit
PB: predicated region body
PF: predicated region fallthrough
CT: control target
= control target key end

     0   :  { %7 = vsyncpa [#allocation3], 0  ;;  %s879_s0 = inlined_call_operand.hbm [shape: f32[2,6400], index: 0, kind: input, shape index: {}]   ;;  %s880_s1 = inlined_call_operand.hbm [shape: f32[1,6400], index: 1, kind: input, shape index: {}]   ;;  %s881_s2 = inlined_call_operand.hbm [shape: f32[2,6400], index: 2, kind: output, shape index: {}]  }
   0x1   :  { %9 = vsyncpa [#allocation3 + $0x1], 0 }
   0x2   :  { %10 = vsyncpa [#allocation6], 0 }
   0x3   :  { %12 = vsyncpa [#allocation6 + $0x1], 0 }
   0x4   :  { %13 = vsyncpa [#allocation4], 0 }
   0x5   :  { %15 = vsyncpa [#allocation4 + $0x1], 0  ;;  %s694_s9 = smov 0   ;;  %s696_s10 = smov 0  }
   0x6   :  { %s698_s11 = smov 0   ;;  %s700_s12 = smov 0  }
   0x7   :  { %s702_s13 = smov 0   ;;  %s704_s14 = smov 0  }
   0x8 LB: > { %s448_s15 = sadd.s32 4294967295, %s677_s14   ;;  %s449_s16 = sadd.s32 4294967294, %s677_s14   ;;  %s677_s14 = sphi %s704_s14, %s21_s14   ;;  %s673_s13 = sphi %s702_s13, %s891_s13   ;;  %s669_s12 = sphi %s700_s12, %s890_s12   ;;  %s665_s11 = sphi %s698_s11, %s889_s11   ;;  %s661_s10 = sphi %s696_s10, %s888_s10   ;;  %s657_s9 = sphi %s694_s9, %s887_s9  }
   0x9   : > { %s33_s17 = sadd.s32 1, %s673_s13  ;;  %s42_s18 = sadd.s32 1, %s665_s11 }
   0xa   : > { %p35_p0 = scmp.ge.s32.totalorder %s33_s17, 2  ;;  %p49_p1 = scmp.ne.s32.totalorder %s665_s11, %s661_s10 }
   0xb   : > { %p50_p2 = scmp.eq.s32.totalorder %s677_s14, 0  ;;  %p55_p3 = scmp.ne.s32.totalorder %s661_s10, %s657_s9 }
   0xc   : > { %s893_s17 = smov (%p35_p0, %s33_s17), 0  ;;  %p56_p5 = scmp.eq.s32.totalorder %s448_s15, 0 }
   0xd   : > { %p735_p4 = por %p50_p2, %p49_p1  ;;  %s38_s20 = ssub.s32 %s673_s13, %s893_s17 }
   0xe   : > { %p107_p6 = scmp.eq.s32.totalorder %s448_s15, 1  ;;  %p40_p7 = scmp.eq.s32.totalorder %s38_s20, 0 }
   0xf   : > { %p741_p8 = por %p56_p5, %p55_p3  ;;  %p113_p10 = scmp.eq.s32.totalorder %s449_s16, 1 }
  0x10   : > { %p745_p9 = por %p107_p6, %p49_p1  ;;  %p451_p12 = scmp.ge.s32.totalorder %s677_s14, 2 }
  0x11   : > { %s750_s23 = scalar_select %p40_p7, %s665_s11, %s42_s18  }
  0x12   : > { %p752_p11 = por %p113_p10, %p55_p3  ;;  %p480_p13 = scmp.lt.s32.totalorder %s677_s14, 2 }
  0x13   : > { %s133_s25 = sand.u32 1, %s665_s11   ;;  %s457_s27 = smul.u32 50, %s673_s13 }
  0x14   : > { %s459_s26 = smul.u32 50, %s133_s25  ;;  %p762_p0 = pnand %p480_p13, %p735_p4 }
  0x15   : > { %p453_p1 = scmp.ge.s32.totalorder %s677_s14, 1  ;;  %s144_s3 = scalar_lea.hbm %s879_s0, %s457_s27 }
  0x16   : > { %s137_s4 = scalar_lea.vmem [#allocation2], %s459_s26  ;;  %s146_s6 = sshll.u32 %s144_s3, 4  ;;  %s147_s6 = int_to_ptr.hbm [resolvable:$true] %s146_s6 }
  0x17   : > { %s148_s5 = sshll.u32 %s137_s4, 4  ;;  %s134_s7 = scalar_lea.sflag [#allocation3], %s133_s25  ;;  %s149_s5 = int_to_ptr.vmem [resolvable:$true] %s148_s5 }
  0x18   : > { %472 = dma.hbm_to_vmem [thread:$0]  (!%p762_p0), %s147_s6, 800, %s149_s5, %s134_s7  }
  0x19   : > { %p172_p2 = scmp.lt.s32.totalorder %s677_s14, 3  ;;  %s460_s8 = smul.u32 25, %s133_s25 }
  0x1a   : > { %s160_s15 = smul.u32 25, %s673_s13  ;;  %s156_s26 = scalar_lea.sflag [#allocation6], %s133_s25 }
  0x1b   : > { %p173_p3 = pnand %p453_p1, %p172_p2  ;;  %s159_s20 = scalar_lea.vmem [#allocation5], %s460_s8 }
  0x1c   : > { %s163_s19 = scalar_lea.hbm %s880_s1, %s160_s15  ;;  %s167_s29 = sshll.u32 %s159_s20, 4  ;;  %s168_s29 = int_to_ptr.vmem [resolvable:$true] %s167_s29 }
  0x1d   : > { %s165_s27 = sshll.u32 %s163_s19, 4  ;;  %176 = sbr.rel (%p173_p3) target bundleno = 65 (0x41), region = 28  ;;  %s166_s27 = int_to_ptr.hbm [resolvable:$true] %s165_s27 }
  0x1e   : > { %475 = dma.hbm_to_vmem [thread:$0]  (!%p762_p0), %s166_s27, 400, %s168_s29, %s156_s26  }
  0x1f   : > { %s780_s30 = sand.u32 (!%p173_p3), 1, %s661_s10  }
  0x20   : > { %s461_s3 = smul.u32 (!%p173_p3), 50, %s780_s30  ;;  %s179_s4 = scalar_lea.sflag (!%p173_p3), [#allocation3], %s780_s30 }
  0x22   : > { %s786_s5 = scalar_lea.vmem [#allocation2], %s461_s3 }
  0x23   : > { %644 = dma.done.wait (%p741_p8), %s179_s4, 800  }
  0x24   : > { %646 = vsyncadd (%p741_p8), %s179_s4, 4294966496  ;;  %s462_s25 = smul.u32 25, %s780_s30  ;;  %s189_s28 = scalar_lea.sflag [#allocation6], %s780_s30 }
  0x26   : > { %s794_s6 = scalar_lea.vmem [#allocation5], %s462_s25 }
  0x27   : > { %648 = dma.done.wait (%p741_p8), %s189_s28, 400  }
  0x28   : > { %650 = vsyncadd (%p741_p8), %s189_s28, 4294966896  ;;  %v229_v0 = vld [vmem:[%s794_s6] sm:$0xff]  ;;  %vm281_vm0 = vcmask 1041408   ;;  %vm283_vm1 = vcmask 1045508   ;;  %vm285_vm2 = vcmask 1043456   ;;  %v230_v5 = vld [vmem:[%s794_s6 + $0x8] sm:$0xff] }
  0x29   : > { %v237_v1 = vperm.slane %v229_v0, 0  ;;  %v238_v2 = vperm.slane %v229_v0, 1  ;;  %v239_v3 = vperm.slane %v229_v0, 2  ;;  %v240_v4 = vperm.slane %v229_v0, 3  ;;  %v222_v14 = vld [vmem:[%s786_s5] sm:$0xff]  ;;  %v223_v21 = vld [vmem:[%s786_s5 + $0x8] sm:$0xff] }
  0x2a   : > { %v241_v6 = vperm.slane %v229_v0, 4  ;;  %v242_v7 = vperm.slane %v229_v0, 5  ;;  %v243_v8 = vperm.slane %v229_v0, 6  ;;  %v244_v9 = vperm.slane %v229_v0, 7  ;;  %v231_v32 = vld [vmem:[%s794_s6 + $0x10] sm:$0xff]  ;;  %s815_s21 = scalar_lea.vmem [#allocation7], %s461_s3 }
  0x2b   : > { %v263_v10 = vrot.slane %v238_v2, 6  ;;  %v264_v11 = vrot.slane %v239_v3, 4  ;;  %v265_v12 = vrot.slane %v240_v4, 2  ;;  %v245_v13 = vperm.slane %v230_v5, 0  ;;  %v224_v34 = vld [vmem:[%s786_s5 + $0x10] sm:$0xff]  ;;  %s458_s7 = smul.u32 50, %s669_s12 }
  0x2c   : > { %v266_v15 = vrot.slane %v242_v7, 6  ;;  %v267_v16 = vrot.slane %v243_v8, 4  ;;  %v268_v17 = vrot.slane %v244_v9, 2  ;;  %v246_v18 = vperm.slane %v230_v5, 1  ;;  %v530_v46 = vld [vmem:[%s794_s6 + $0x18] ss:$0 sm:$0xff] }
  0x2d   : > { %v282_v19 = vsel %vm281_vm0, %v237_v1, %v263_v10  ;;  %v284_v20 = vsel %vm283_vm1, %v264_v11, %v265_v12  ;;  %v247_v22 = vperm.slane %v230_v5, 2  ;;  %v248_v23 = vperm.slane %v230_v5, 3  ;;  %v228_v51 = vld [vmem:[%s786_s5 + $0x30] sm:$0x3]  ;;  %v225_v52 = vld [vmem:[%s786_s5 + $0x18] sm:$0xff]  ;;  %v226_v62 = vld [vmem:[%s786_s5 + $0x20] sm:$0xff]  ;;  %s336_s15 = scalar_lea.hbm %s881_s2, %s458_s7 }
  0x2e   : > { %v286_v24 = vsel %vm285_vm2, %v282_v19, %v284_v20  ;;  %v287_v25 = vsel %vm281_vm0, %v241_v6, %v266_v15  ;;  %v288_v26 = vsel %vm283_vm1, %v267_v16, %v268_v17  ;;  %v269_v27 = vrot.slane %v246_v18, 6  ;;  %v227_v9 = vld [vmem:[%s786_s5 + $0x28] sm:$0xff]  ;;  %s338_s16 = sshll.u32 %s815_s21, 4  ;;  %s340_s18 = sshll.u32 %s336_s15, 4  ;;  %s339_s16 = int_to_ptr.vmem [resolvable:$true] %s338_s16  ;;  %s341_s18 = int_to_ptr.hbm [resolvable:$true] %s340_s18 }
  0x2f   : > { %v308_v28 = vadd.f32 %v286_v24, %v222_v14  ;;  %v289_v29 = vsel %vm285_vm2, %v287_v25, %v288_v26  ;;  %v270_v30 = vrot.slane %v247_v22, 4  ;;  %v271_v31 = vrot.slane %v248_v23, 2  ;;  %s323_s19 = scalar_lea.sflag [#allocation4], %s780_s30  ;;  %s605_s20 = sshra.s32 %s341_s18, 4  ;;  %s606_s20 = int_to_ptr.hbm [resolvable:$true] %s605_s20 }
  0x30   : > { %v309_v33 = vadd.f32 %v289_v29, %v223_v21  ;;  %v290_v35 = vsel %vm281_vm0, %v245_v13, %v269_v27  ;;  %v249_v36 = vperm.slane %v230_v5, 4  ;;  %v250_v37 = vperm.slane %v230_v5, 5  ;;  %s607_s29 = scalar_lea.hbm %s606_s20, 50  ;;  %s611_s3 = scalar_lea.hbm %s881_s2, 100 }
  0x31   : > { %315 = vst [vmem:[%s815_s21] sm:$0xff] %v308_v28  ;;  %v291_v38 = vsel %vm283_vm1, %v270_v30, %v271_v31  ;;  %v251_v39 = vperm.slane %v230_v5, 6  ;;  %v252_v40 = vperm.slane %v230_v5, 7  ;;  %v253_v41 = vperm.slane %v231_v32, 0  ;;  %p608_p4 = scmp.ne.s32.totalorder %s606_s20, %s607_s29  ;;  %p612_p7 = scmp.lt.s32.totalorder %s606_s20, %s881_s2 }
  0x32   : > { %316 = vst [vmem:[%s815_s21 + $0x8] sm:$0xff] %v309_v33  ;;  %v292_v42 = vsel %vm285_vm2, %v290_v35, %v291_v38  ;;  %v272_v43 = vrot.slane %v250_v37, 6  ;;  %v254_v44 = vperm.slane %v231_v32, 1  ;;  %v255_v45 = vperm.slane %v231_v32, 2  ;;  %p613_p8 = scmp.lt.s32.totalorder %s611_s3, %s607_s29 }
  0x33   : > { %v310_v47 = vadd.f32 %v292_v42, %v224_v34  ;;  %v273_v48 = vrot.slane %v251_v39, 4  ;;  %v274_v49 = vrot.slane %v252_v40, 2  ;;  %v256_v50 = vperm.slane %v231_v32, 3  ;;  %p609_p5 = pnand %p608_p4, %p745_p9 }
  0x34   : > { %v293_v53 = vsel %vm281_vm0, %v249_v36, %v272_v43  ;;  %v275_v54 = vrot.slane %v254_v44, 6  ;;  %v276_v55 = vrot.slane %v255_v45, 4  ;;  %v257_v56 = vperm.slane %v231_v32, 4  ;;  %p614_p10 = por %p613_p8, %p612_p7 }
  0x35   : > { %317 = vst [vmem:[%s815_s21 + $0x10] sm:$0xff] %v310_v47  ;;  %v294_v57 = vsel %vm283_vm1, %v273_v48, %v274_v49  ;;  %v277_v58 = vrot.slane %v256_v50, 2  ;;  %v258_v59 = vperm.slane %v231_v32, 5  ;;  %v259_v60 = vperm.slane %v231_v32, 6  ;;  %p610_p6 = pneg %p609_p5 }
  0x36   : > { %v295_v61 = vsel %vm285_vm2, %v293_v53, %v294_v57  ;;  %v296_v63 = vsel %vm281_vm0, %v253_v41, %v275_v54  ;;  %v260_v0 = vperm.slane %v231_v32, 7  ;;  %v314_v1 = vadd.f32 %v530_v46, %v228_v51 }
  0x37   : > { %v311_v2 = vadd.f32 %v295_v61, %v225_v52  ;;  %v297_v3 = vsel %vm283_vm1, %v276_v55, %v277_v58  ;;  %v278_v4 = vrot.slane %v258_v59, 6  ;;  %v279_v5 = vrot.slane %v259_v60, 4  ;;  %p615_p13 = pnand %p614_p10, %p610_p6 }
  0x38   : > { %v298_v6 = vsel %vm285_vm2, %v296_v63, %v297_v3  ;;  %v280_v7 = vrot.slane %v260_v0, 2  ;;  %321 = vst [vmem:[%s815_s21 + $0x30] sm:$0x3] %v314_v1 }
  0x39   : > { %318 = vst [vmem:[%s815_s21 + $0x18] sm:$0xff] %v311_v2  ;;  %v312_v8 = vadd.f32 %v298_v6, %v226_v62  ;;  %v299_v10 = vsel %vm281_vm0, %v257_v56, %v278_v4 }
  0x3a   : > { %v300_v11 = vsel %vm283_vm1, %v279_v5, %v280_v7 }
  0x3b   : > { %319 = vst [vmem:[%s815_s21 + $0x20] sm:$0xff] %v312_v8  ;;  %v301_v12 = vsel %vm285_vm2, %v299_v10, %v300_v11 }
  0x3c   : > { %v313_v13 = vadd.f32 %v301_v12, %v227_v9 }
  0x3e   : > { %320 = vst [vmem:[%s815_s21 + $0x28] sm:$0xff] %v313_v13 }
  0x3f   : > { %618 = shalt.err (!%p615_p13)
}
  0x40   : > { %467 = dma.vmem_to_hbm [thread:$0]  (%p745_p9), %s339_s16, 800, %s341_s18, %s323_s19  }
  0x41 PF: > { %s352_s30 = sand.u32 1, %s657_s9   ;;  %p477_p0 = pnand %p451_p12, %p752_p11 }
  0x42   : > { %s353_s25 = scalar_lea.sflag [#allocation4], %s352_s30 }
  0x43   : > { %p478_p1 = pneg %p477_p0 }
  0x45   : > { %652 = dma.done.wait (%p478_p1), %s353_s25, 800  }
  0x46   : > { %654 = vsyncadd (%p478_p1), %s353_s25, 4294966496  ;;  %s21_s14 = sadd.s32 1, %s677_s14   ;;  %s887_s9 = smov %s661_s10 }
  0x47   : > { %p18_p2 = scmp.ge.s32.totalorder %s21_s14, 4   ;;  %s888_s10 = smov %s665_s11 }
  0x48   : > { %s889_s11 = smov %s750_s23  ;;  %s890_s12 = smov %s673_s13 }
  0x49   : > { %s891_s13 = smov %s893_s17  ;;  %20 = sbr.rel (!%p18_p2) target bundleno = 8 (0x8), region = 86 }
  0x4e   :  { %359 = vsyncpa [#allocation3], 1 }
  0x4f   :  { %361 = vsyncpa [#allocation3 + $0x1], 1 }
  0x50   :  { %362 = vsyncpa [#allocation6], 1 }
  0x51   :  { %364 = vsyncpa [#allocation6 + $0x1], 1 }
  0x52   :  { %365 = vsyncpa [#allocation4], 1 }
  0x53   :  { %367 = vsyncpa [#allocation4 + $0x1], 1 }

</bundles_post_ra>
